<compile_context>
chip_gen: v7x
topology: tpu7x:2x2x1
jax: 0.10.0
libtpu: 0.0.40
codegen_flags: <defaults>
</compile_context>

<pallas_src>
import functools
import math

import jax
import jax.numpy as jnp
from jax.experimental import pallas as pl
from jax.experimental.pallas import tpu as pltpu


_FALLBACK_VMEM_BUDGET = 48 * 1024 * 1024      # safe on v7x (64 MiB physical) and v5e/v6e
_TILE_CANDS = (1024, 768, 512, 384, 256, 128)  # multiples of 128 (256-multiples preferred)


def _round_up(x, m):
    return ((x + m - 1) // m) * m


def _vmem_budget_bytes():
    """75% of physical VMEM for this device generation; conservative fallback otherwise."""
    try:
        info = pltpu.get_tpu_info()
        cap = getattr(info, "vmem_capacity_bytes", None)
        if cap:
            return int(cap) * 3 // 4
    except Exception:
        pass
    return _FALLBACK_VMEM_BUDGET


def _stage1_vmem_bytes(bn, te, fp, h_itemsize):
    return (2 * te * bn * h_itemsize      # H^T tiles (double-buffered)
            + 2 * bn * fp * 4             # X tiles (double-buffered)
            + 2 * (bn + te) * 4           # dv^{-1/2} / de^{-1} tiles
            + te * fp * 4                 # f32 scratch accumulator
            + 2 * te * fp * 4)            # output block (counted double-buffered)


def _stage2_vmem_bytes(bn, te, fp, h_itemsize):
    return (2 * bn * te * h_itemsize      # H tiles
            + 2 * te * fp * 4             # M tiles
            + 2 * bn * 4                  # dv^{-1/2} tiles
            + bn * fp * 4                 # f32 scratch accumulator
            + 2 * bn * fp * 4)            # output tiles


def _pick_tiles(n, e, fp, h_itemsize, budget, block_n=None, block_e=None):
    """Largest (bn, te), multiples of 128, whose per-stage VMEM use fits the budget."""
    n128 = _round_up(n, 128)
    e128 = _round_up(e, 128)

    def cands(cap, user):
        if user is not None:
            return [max(128, min(_round_up(user, 128), cap))]
        return sorted({min(c, cap) for c in _TILE_CANDS}, reverse=True)

    best = None
    for bn in cands(n128, block_n):
        for te in cands(e128, block_e):
            need = max(_stage1_vmem_bytes(bn, te, fp, h_itemsize),
                       _stage2_vmem_bytes(bn, te, fp, h_itemsize))
            if need > budget:
                continue
            score = (bn * te, bn + te, bn)
            if best is None or score > best[0]:
                best = (score, bn, te)
    if best is None:
        # NOTE: for very large F even (128, Fp) blocks exceed VMEM; an F-tiled third grid
        # axis would be needed.  Fall back to the smallest tiles and let Mosaic report.
        return 128, 128
    return best[1], best[2]


# ---------------------------------------------------------------------------
# Stage 1: M = D_e^{-1} @ (H^T @ (D_v^{-1/2} @ X))           shape (Ep, Fp)
#   grid (Ep/te, Np/bn): e-tiles are independent ("parallel", shards across v7x's 2 TCs),
#   n is the reduction axis ("arbitrary").  Accumulation lives in a (te, Fp) f32 VMEM
#   scratch; the output block is stored exactly once, at the last n step.
# ---------------------------------------------------------------------------
def _stage1_kernel(ht_ref, x_ref, dvis_ref, deinv_ref, m_ref, acc_ref, *, native_bf16):
    n = pl.program_id(1)

    @pl.when(n == 0)
    def _():
        acc_ref[...] = jnp.zeros_like(acc_ref)

    ht = ht_ref[...]                                   # (te, bn) tile of H^T (bf16/f32)
    xs = x_ref[...] * dvis_ref[...]                    # (bn, Fp): row-scale by dv^{-1/2}
    if native_bf16:
        # Native low-precision MXU matmul with f32 accumulation (~1e-3 rel. error).
        prod = jnp.dot(ht, xs.astype(ht.dtype), preferred_element_type=jnp.float32)
    else:
        # Matches the f32 reference to 1e-4: upcast the (binary, bf16-exact) H tile.
        prod = jnp.dot(ht.astype(jnp.float32), xs, preferred_element_type=jnp.float32)
    acc_ref[...] += prod

    @pl.when(n == pl.num_programs(1) - 1)
    def _():
        # Fold D_e^{-1} in exactly once; de^{-1} is column-shaped (te, 1): no reshape.
        m_ref[...] = acc_ref[...] * deinv_ref[...]


# ---------------------------------------------------------------------------
# Stage 2: out = D_v^{-1/2} @ (H @ M)                         shape (Np, Fp)
#   grid (Np/bn, Ep/te): row tiles are independent ("parallel"), e is the contraction
#   axis ("arbitrary") with a (bn, Fp) f32 VMEM scratch accumulator.
# ---------------------------------------------------------------------------
def _stage2_kernel(h_ref, m_ref, dvis_ref, out_ref, acc_ref, *, native_bf16):
    e = pl.program_id(1)

    @pl.when(e == 0)
    def _():
        acc_ref[...] = jnp.zeros_like(acc_ref)

    h = h_ref[...]                                     # (bn, te) tile of H
    if native_bf16:
        prod = jnp.dot(h, m_ref[...].astype(h.dtype), preferred_element_type=jnp.float32)
    else:
        prod = jnp.dot(h.astype(jnp.float32), m_ref[...],
                       preferred_element_type=jnp.float32)
    acc_ref[...] += prod

    @pl.when(e == pl.num_programs(1) - 1)
    def _():
        out_ref[...] = acc_ref[...] * dvis_ref[...]    # row-scale by dv^{-1/2}, store once


@functools.partial(
    jax.jit,
    static_argnames=("bn", "te", "vmem_limit", "h_matmul_dtype", "native_bf16"))
def _forward(H, X, *, bn, te, vmem_limit, h_matmul_dtype, native_bf16):
    H = jnp.asarray(H, jnp.float32)
    X = jnp.asarray(X, jnp.float32)
    N, E = H.shape
    F = X.shape[1]

    # Degrees from the original (unpadded) f32 H -- exact, matches the reference formulas
    # 1/sqrt(dv + 1e-10) and 1/(de + 1e-10).
    dv = jnp.sum(H, axis=1)
    de = jnp.sum(H, axis=0)
    dv_inv_sqrt = (1.0 / jnp.sqrt(dv + 1e-10)).reshape(N, 1)
    de_inv = (1.0 / (de + 1e-10)).reshape(E, 1)

    Fp = _round_up(F, 128)
    Np = _round_up(N, bn)
    Ep = _round_up(E, te)

    # Pad/cast H directly into the streaming dtype (no padded f32 intermediate); padding
    # with zeros is mathematically inert everywhere in this pipeline.
    Hm_cast = H.astype(h_matmul_dtype)
    Hm = jnp.zeros((Np, Ep), h_matmul_dtype).at[:N, :E].set(Hm_cast)
    HmT = jnp.zeros((Ep, Np), h_matmul_dtype).at[:E, :N].set(Hm_cast.T)
    Xp = jnp.zeros((Np, Fp), jnp.float32).at[:N, :F].set(X)
    dvis_p = jnp.zeros((Np, 1), jnp.float32).at[:N].set(dv_inv_sqrt)
    deinv_p = jnp.zeros((Ep, 1), jnp.float32).at[:E].set(de_inv)

    g_e, g_n = Ep // te, Np // bn
    matmul_flops = 2 * Np * Ep * Fp
    h_bytes = jnp.dtype(h_matmul_dtype).itemsize * Np * Ep

    # ----- Stage 1: M = D_e^{-1} H^T D_v^{-1/2} X -----
    M = pl.pallas_call(
        functools.partial(_stage1_kernel, native_bf16=native_bf16),
        out_shape=jax.ShapeDtypeStruct((Ep, Fp), jnp.float32),
        grid=(g_e, g_n),
        in_specs=[
            pl.BlockSpec((te, bn), lambda e, n: (e, n)),   # H^T tile (streamed once)
            pl.BlockSpec((bn, Fp), lambda e, n: (n, 0)),   # X tile (re-read per e-tile)
            pl.BlockSpec((bn, 1), lambda e, n: (n, 0)),    # dv^{-1/2} tile
            pl.BlockSpec((te, 1), lambda e, n: (e, 0)),    # de^{-1} tile
        ],
        out_specs=pl.BlockSpec((te, Fp), lambda e, n: (e, 0)),
        scratch_shapes=[pltpu.VMEM((te, Fp), jnp.float32)],
        compiler_params=pltpu.CompilerParams(
            dimension_semantics=("parallel", "arbitrary"),
            vmem_limit_bytes=vmem_limit),
        cost_estimate=pl.CostEstimate(
            flops=matmul_flops + Np * Fp + Ep * Fp,
            transcendentals=0,
            bytes_accessed=h_bytes + 4 * g_e * Np * Fp + 4 * (Np + Ep) + 4 * Ep * Fp),
    )(HmT, Xp, dvis_p, deinv_p)

    # ----- Stage 2: out = D_v^{-1/2} H M -----
    out_p = pl.pallas_call(
        functools.partial(_stage2_kernel, native_bf16=native_bf16),
        out_shape=jax.ShapeDtypeStruct((Np, Fp), jnp.float32),
        grid=(g_n, g_e),
        in_specs=[
            pl.BlockSpec((bn, te), lambda n, e: (n, e)),   # H tile (streamed once)
            pl.BlockSpec((te, Fp), lambda n, e: (e, 0)),   # M tile (re-read per n-tile)
            pl.BlockSpec((bn, 1), lambda n, e: (n, 0)),    # dv^{-1/2} tile
        ],
        out_specs=pl.BlockSpec((bn, Fp), lambda n, e: (n, 0)),
        scratch_shapes=[pltpu.VMEM((bn, Fp), jnp.float32)],
        compiler_params=pltpu.CompilerParams(
            dimension_semantics=("parallel", "arbitrary"),
            vmem_limit_bytes=vmem_limit),
        cost_estimate=pl.CostEstimate(
            flops=matmul_flops + Np * Fp,
            transcendentals=0,
            bytes_accessed=h_bytes + 4 * g_n * Ep * Fp + 4 * Np + 4 * Np * Fp),
    )(Hm, M, dvis_p)

    return out_p[:N, :F]


def hypergraph_nn_forward(incidence_matrix, features, *, block_n=None, block_e=None,
                          h_matmul_dtype=jnp.bfloat16, native_bf16_matmul=False):
    """HypergraphNN.forward(incidence_matrix, features) via two tiled Pallas kernels.

    h_matmul_dtype=bfloat16 is exact only for a binary incidence matrix; pass
    jnp.float32 for a weighted H.  native_bf16_matmul=True trades ~1e-3 relative error
    for native bf16 MXU throughput.
    """
    N, E = incidence_matrix.shape
    F = features.shape[-1]
    Fp = _round_up(F, 128)
    budget = _vmem_budget_bytes()
    bn, te = _pick_tiles(N, E, Fp, jnp.dtype(h_matmul_dtype).itemsize, budget,
                         block_n, block_e)
    return _forward(incidence_matrix, features, bn=bn, te=te, vmem_limit=int(budget),
                    h_matmul_dtype=h_matmul_dtype, native_bf16=bool(native_bf16_matmul))


def _xavier_uniform(key, shape):
    fan_in, fan_out = shape
    bound = math.sqrt(6.0 / (fan_in + fan_out))
    return jax.random.uniform(key, shape, jnp.float32, -bound, bound)


def _reference_forward(H, feats):
    """Pure-JAX reference mirroring the PyTorch module exactly."""
    dv = jnp.sum(H, axis=1)
    de = jnp.sum(H, axis=0)
    D_v_inv_sqrt = jnp.diag(1.0 / jnp.sqrt(dv + 1e-10))
    D_e_inv = jnp.diag(1.0 / (de + 1e-10))
    X = D_v_inv_sqrt @ feats
    X = H.T @ X
    X = D_e_inv @ X
    X = H @ X
    X = D_v_inv_sqrt @ X
    return X


if __name__ == "__main__":
    key = jax.random.PRNGKey(0)
    k_h, k_f, k_t, k_w, k_tf = jax.random.split(key, 5)

    # Small shapes: N=32 vertices, E=16 hyperedges, feature dim=32.
    N, E, Fdim = 32, 16, 32
    input_dim, hidden_dim, output_dim = Fdim, 32, 16

    # Module parameters (unused in forward(); initialized for fidelity, then discarded).
    theta = _xavier_uniform(k_t, (input_dim, hidden_dim))
    W = _xavier_uniform(k_w, (hidden_dim, hidden_dim))
    theta_final = _xavier_uniform(k_tf, (hidden_dim, output_dim))
    del theta, W, theta_final

    # Binary incidence matrix + dense features.
    incidence = (jax.random.uniform(k_h, (N, E)) > 0.6).astype(jnp.float32)
    features = jax.random.normal(k_f, (N, Fdim), jnp.float32)

    out = hypergraph_nn_forward(incidence, features)
    out = jax.block_until_ready(out)

    ref = _reference_forward(incidence, features)
    assert out.shape == (N, Fdim)
    assert jnp.allclose(out, ref, atol=1e-4, rtol=1e-4), "mismatch vs reference"

    print("KERNEL_OK")
</pallas_src>

<mosaic_0001>
module attributes {stable_mosaic.version = 11 : i64} {
  func.func @_stage2_kernel(%arg0: i32, %arg1: i32, %arg2: memref<128x128xbf16, #tpu.memory_space<vmem>>, %arg3: memref<128x128xf32, #tpu.memory_space<vmem>>, %arg4: memref<128x1xf32, #tpu.memory_space<vmem>>, %arg5: memref<128x128xf32, #tpu.memory_space<vmem>>, %arg6: memref<128x128xf32, #tpu.memory_space<vmem>>) attributes {dimension_semantics = [#tpu.dimension_semantics<parallel>, #tpu.dimension_semantics<arbitrary>], iteration_bounds = array<i64: 1, 1>, scalar_prefetch = 0 : i64, scratch_operands = 1 : i64, tpu.core_type = #tpu.core_type<tc>, window_params = [{transform_indices = @transform_0, window_bounds = array<i64: 128, 128>}, {transform_indices = @transform_1, window_bounds = array<i64: 128, 128>}, {transform_indices = @transform_2, window_bounds = array<i64: 128, 1>}, {transform_indices = @transform_3, window_bounds = array<i64: 128, 128>}]} {
    %c0_i32 = arith.constant 0 : i32
    %0 = arith.cmpi eq, %arg1, %c0_i32 : i32
    %1 = arith.extui %0 : i1 to i32
    %c0_i32_0 = arith.constant 0 : i32
    %2 = arith.cmpi ne, %1, %c0_i32_0 : i32
    scf.if %2 {
      %cst_10 = arith.constant 0.000000e+00 : f32
      %13 = vector.broadcast %cst_10 : f32 to vector<128x128xf32>
      %c0_11 = arith.constant 0 : index
      %c0_12 = arith.constant 0 : index
      %14 = vector.load %arg6[%c0_11, %c0_12] : memref<128x128xf32, #tpu.memory_space<vmem>>, vector<128x128xf32>
      tpu.vector_store %arg6[%c0_11, %c0_12], %13 {strides = array<i32>} : memref<128x128xf32, #tpu.memory_space<vmem>>, vector<128x128xf32>,
    } else {
    }
    %c0 = arith.constant 0 : index
    %c0_1 = arith.constant 0 : index
    %3 = vector.load %arg2[%c0, %c0_1] : memref<128x128xbf16, #tpu.memory_space<vmem>>, vector<128x128xbf16>
    %4 = arith.extf %3 : vector<128x128xbf16> to vector<128x128xf32>
    %c0_2 = arith.constant 0 : index
    %c0_3 = arith.constant 0 : index
    %5 = vector.load %arg3[%c0_2, %c0_3] : memref<128x128xf32, #tpu.memory_space<vmem>>, vector<128x128xf32>
    %cst = arith.constant dense<0.000000e+00> : vector<128x128xf32>
    %6 = tpu.matmul %4, %5, %cst {dimension_numbers = #tpu.dot_dimension_numbers<[1], [0], [0], [1], [0, 0, 1, 1], [], []>} : vector<128x128xf32>, vector<128x128xf32>, vector<128x128xf32> -> vector<128x128xf32>
    %c0_4 = arith.constant 0 : index
    %c0_5 = arith.constant 0 : index
    %7 = vector.load %arg6[%c0_4, %c0_5] : memref<128x128xf32, #tpu.memory_space<vmem>>, vector<128x128xf32>
    %8 = arith.addf %7, %6 : vector<128x128xf32>
    %c0_6 = arith.constant 0 : index
    %c0_7 = arith.constant 0 : index
    %9 = vector.load %arg6[%c0_6, %c0_7] : memref<128x128xf32, #tpu.memory_space<vmem>>, vector<128x128xf32>
    tpu.vector_store %arg6[%c0_6, %c0_7], %8 {strides = array<i32>} : memref<128x128xf32, #tpu.memory_space<vmem>>, vector<128x128xf32>,
    %c0_i32_8 = arith.constant 0 : i32
    %10 = arith.cmpi eq, %arg1, %c0_i32_8 : i32
    %11 = arith.extui %10 : i1 to i32
    %c0_i32_9 = arith.constant 0 : i32
    %12 = arith.cmpi ne, %11, %c0_i32_9 : i32
    scf.if %12 {
      %c0_10 = arith.constant 0 : index
      %c0_11 = arith.constant 0 : index
      %13 = vector.load %arg6[%c0_10, %c0_11] : memref<128x128xf32, #tpu.memory_space<vmem>>, vector<128x128xf32>
      %c0_12 = arith.constant 0 : index
      %c0_13 = arith.constant 0 : index
      %14 = vector.load %arg4[%c0_12, %c0_13] : memref<128x1xf32, #tpu.memory_space<vmem>>, vector<128x1xf32>
      %15 = vector.broadcast %14 : vector<128x1xf32> to vector<128x128xf32>
      %16 = arith.mulf %13, %15 : vector<128x128xf32>
      %c0_14 = arith.constant 0 : index
      %c0_15 = arith.constant 0 : index
      %17 = vector.load %arg5[%c0_14, %c0_15] : memref<128x128xf32, #tpu.memory_space<vmem>>, vector<128x128xf32>
      tpu.vector_store %arg5[%c0_14, %c0_15], %16 {strides = array<i32>} : memref<128x128xf32, #tpu.memory_space<vmem>>, vector<128x128xf32>,
    } else {
    }
    return
  }
  func.func @transform_0(%arg0: i32, %arg1: i32) -> (i32, i32) {
    %c0_i32 = arith.constant 0 : i32
    return %arg0, %arg1 : i32, i32
  }
  func.func @transform_1(%arg0: i32, %arg1: i32) -> (i32, i32) {
    %c0_i32 = arith.constant 0 : i32
    %c0_i32_0 = arith.constant 0 : i32
    return %arg1, %c0_i32 : i32, i32
  }
  func.func @transform_2(%arg0: i32, %arg1: i32) -> (i32, i32) {
    %c0_i32 = arith.constant 0 : i32
    %c0_i32_0 = arith.constant 0 : i32
    return %arg0, %c0_i32 : i32, i32
  }
  func.func @transform_3(%arg0: i32, %arg1: i32) -> (i32, i32) {
    %c0_i32 = arith.constant 0 : i32
    %c0_i32_0 = arith.constant 0 : i32
    return %arg0, %c0_i32 : i32, i32
  }
}

module attributes {stable_mosaic.version = 11 : i64} {
  func.func @_stage1_kernel(%arg0: i32, %arg1: i32, %arg2: memref<128x128xbf16, #tpu.memory_space<vmem>>, %arg3: memref<128x128xf32, #tpu.memory_space<vmem>>, %arg4: memref<128x1xf32, #tpu.memory_space<vmem>>, %arg5: memref<128x1xf32, #tpu.memory_space<vmem>>, %arg6: memref<128x128xf32, #tpu.memory_space<vmem>>, %arg7: memref<128x128xf32, #tpu.memory_space<vmem>>) attributes {dimension_semantics = [#tpu.dimension_semantics<parallel>, #tpu.dimension_semantics<arbitrary>], iteration_bounds = array<i64: 1, 1>, scalar_prefetch = 0 : i64, scratch_operands = 1 : i64, tpu.core_type = #tpu.core_type<tc>, window_params = [{transform_indices = @transform_0, window_bounds = array<i64: 128, 128>}, {transform_indices = @transform_1, window_bounds = array<i64: 128, 128>}, {transform_indices = @transform_2, window_bounds = array<i64: 128, 1>}, {transform_indices = @transform_3, window_bounds = array<i64: 128, 1>}, {transform_indices = @transform_4, window_bounds = array<i64: 128, 128>}]} {
    %c0_i32 = arith.constant 0 : i32
    %0 = arith.cmpi eq, %arg1, %c0_i32 : i32
    %1 = arith.extui %0 : i1 to i32
    %c0_i32_0 = arith.constant 0 : i32
    %2 = arith.cmpi ne, %1, %c0_i32_0 : i32
    scf.if %2 {
      %cst_12 = arith.constant 0.000000e+00 : f32
      %16 = vector.broadcast %cst_12 : f32 to vector<128x128xf32>
      %c0_13 = arith.constant 0 : index
      %c0_14 = arith.constant 0 : index
      %17 = vector.load %arg7[%c0_13, %c0_14] : memref<128x128xf32, #tpu.memory_space<vmem>>, vector<128x128xf32>
      tpu.vector_store %arg7[%c0_13, %c0_14], %16 {strides = array<i32>} : memref<128x128xf32, #tpu.memory_space<vmem>>, vector<128x128xf32>,
    } else {
    }
    %c0 = arith.constant 0 : index
    %c0_1 = arith.constant 0 : index
    %3 = vector.load %arg2[%c0, %c0_1] : memref<128x128xbf16, #tpu.memory_space<vmem>>, vector<128x128xbf16>
    %c0_2 = arith.constant 0 : index
    %c0_3 = arith.constant 0 : index
    %4 = vector.load %arg3[%c0_2, %c0_3] : memref<128x128xf32, #tpu.memory_space<vmem>>, vector<128x128xf32>
    %c0_4 = arith.constant 0 : index
    %c0_5 = arith.constant 0 : index
    %5 = vector.load %arg4[%c0_4, %c0_5] : memref<128x1xf32, #tpu.memory_space<vmem>>, vector<128x1xf32>
    %6 = vector.broadcast %5 : vector<128x1xf32> to vector<128x128xf32>
    %7 = arith.mulf %4, %6 : vector<128x128xf32>
    %8 = arith.extf %3 : vector<128x128xbf16> to vector<128x128xf32>
    %cst = arith.constant dense<0.000000e+00> : vector<128x128xf32>
    %9 = tpu.matmul %8, %7, %cst {dimension_numbers = #tpu.dot_dimension_numbers<[1], [0], [0], [1], [0, 0, 1, 1], [], []>} : vector<128x128xf32>, vector<128x128xf32>, vector<128x128xf32> -> vector<128x128xf32>
    %c0_6 = arith.constant 0 : index
    %c0_7 = arith.constant 0 : index
    %10 = vector.load %arg7[%c0_6, %c0_7] : memref<128x128xf32, #tpu.memory_space<vmem>>, vector<128x128xf32>
    %11 = arith.addf %10, %9 : vector<128x128xf32>
    %c0_8 = arith.constant 0 : index
    %c0_9 = arith.constant 0 : index
    %12 = vector.load %arg7[%c0_8, %c0_9] : memref<128x128xf32, #tpu.memory_space<vmem>>, vector<128x128xf32>
    tpu.vector_store %arg7[%c0_8, %c0_9], %11 {strides = array<i32>} : memref<128x128xf32, #tpu.memory_space<vmem>>, vector<128x128xf32>,
    %c0_i32_10 = arith.constant 0 : i32
    %13 = arith.cmpi eq, %arg1, %c0_i32_10 : i32
    %14 = arith.extui %13 : i1 to i32
    %c0_i32_11 = arith.constant 0 : i32
    %15 = arith.cmpi ne, %14, %c0_i32_11 : i32
    scf.if %15 {
      %c0_12 = arith.constant 0 : index
      %c0_13 = arith.constant 0 : index
      %16 = vector.load %arg7[%c0_12, %c0_13] : memref<128x128xf32, #tpu.memory_space<vmem>>, vector<128x128xf32>
      %c0_14 = arith.constant 0 : index
      %c0_15 = arith.constant 0 : index
      %17 = vector.load %arg5[%c0_14, %c0_15] : memref<128x1xf32, #tpu.memory_space<vmem>>, vector<128x1xf32>
      %18 = vector.broadcast %17 : vector<128x1xf32> to vector<128x128xf32>
      %19 = arith.mulf %16, %18 : vector<128x128xf32>
      %c0_16 = arith.constant 0 : index
      %c0_17 = arith.constant 0 : index
      %20 = vector.load %arg6[%c0_16, %c0_17] : memref<128x128xf32, #tpu.memory_space<vmem>>, vector<128x128xf32>
      tpu.vector_store %arg6[%c0_16, %c0_17], %19 {strides = array<i32>} : memref<128x128xf32, #tpu.memory_space<vmem>>, vector<128x128xf32>,
    } else {
    }
    return
  }
  func.func @transform_0(%arg0: i32, %arg1: i32) -> (i32, i32) {
    %c0_i32 = arith.constant 0 : i32
    return %arg0, %arg1 : i32, i32
  }
  func.func @transform_1(%arg0: i32, %arg1: i32) -> (i32, i32) {
    %c0_i32 = arith.constant 0 : i32
    %c0_i32_0 = arith.constant 0 : i32
    return %arg1, %c0_i32 : i32, i32
  }
  func.func @transform_2(%arg0: i32, %arg1: i32) -> (i32, i32) {
    %c0_i32 = arith.constant 0 : i32
    %c0_i32_0 = arith.constant 0 : i32
    return %arg1, %c0_i32 : i32, i32
  }
  func.func @transform_3(%arg0: i32, %arg1: i32) -> (i32, i32) {
    %c0_i32 = arith.constant 0 : i32
    %c0_i32_0 = arith.constant 0 : i32
    return %arg0, %c0_i32 : i32, i32
  }
  func.func @transform_4(%arg0: i32, %arg1: i32) -> (i32, i32) {
    %c0_i32 = arith.constant 0 : i32
    %c0_i32_0 = arith.constant 0 : i32
    return %arg0, %c0_i32 : i32, i32
  }
}

</mosaic_0001>

<bundles_post_ra>
// kernel: _forward.3
= control target key start
LH: loop header
LB: loop body
LE: loop exit
PB: predicated region body
PF: predicated region fallthrough
CT: control target
= control target key end

     0   :  { %v604_v3 = vmov 0   ;;  %s801_s1 = inlined_call_operand.vmem [shape: f32[128,128], index: 1, kind: input, shape index: {}]   ;;  %s802_s0 = inlined_call_operand.vmem [shape: bf16[128,128], index: 0, kind: input, shape index: {}]   ;;  %s803_s2 = inlined_call_operand.vmem [shape: f32[128,1], index: 2, kind: input, shape index: {}]   ;;  %s804_s3 = inlined_call_operand.vmem [shape: f32[128,128], index: 3, kind: output, shape index: {}]  }
   0x1   :  { %v66_v0 = vld [vmem:[%s801_s1] sm:$0xff]  ;;  %v67_v1 = vld [vmem:[%s801_s1 + $0x8] sm:$0xff]  ;;  %v68_v2 = vld [vmem:[%s801_s1 + $0x10] sm:$0xff]  ;;  %603 = vset.pattern.permute.xlu1 %v604_v3  ;;  %602 = vset.pattern.permute.xlu0 %v604_v3 }
   0x2   :  { %v553_v4 = vpack.c.bf16 %v67_v1, %v66_v0  ;;  %v69_v5 = vld [vmem:[%s801_s1 + $0x18] sm:$0xff]  ;;  %v70_v7 = vld [vmem:[%s801_s1 + $0x20] sm:$0xff]  ;;  %v71_v8 = vld [vmem:[%s801_s1 + $0x28] sm:$0xff] }
   0x3   :  { %v557_v6 = vpack.c.bf16 %v69_v5, %v68_v2  ;;  %v561_v9 = vpack.c.bf16 %v71_v8, %v70_v7  ;;  %v646_v10 = vld [vmem:[%s802_s0] sm:$0xff]   ;;  %v72_v12 = vld [vmem:[%s801_s1 + $0x30] sm:$0xff]  ;;  %v73_v13 = vld [vmem:[%s801_s1 + $0x38] sm:$0xff] }
   0x4   :  { %554 = vmatprep.subr.bf16.mxu0 %v553_v4  ;;  %585 = vmatprep.subr.bf16.mxu1 %v553_v4  ;;  %v651_v11 = vld [vmem:[%s802_s0 + $0x20] sm:$0xff]   ;;  %v428_v14 = vunpack.c.l.bf16 %v646_v10  ;;  %v296_v16 = vld [vmem:[%s803_s2 + $0x10] sm:$0xff]  ;;  %v565_v18 = vpack.c.bf16 %v73_v13, %v72_v12  ;;  %v75_v20 = vld [vmem:[%s801_s1 + $0x48] sm:$0xff]  ;;  %v429_v43 = vunpack.c.h.bf16 %v646_v10 }
   0x5   :  { %556 = vmatpush3.bf16.msra.mxu0 %v553_v4  ;;  %593 = vmatpush3.bf16.msra.mxu1 %v553_v4  ;;  %v444_v15 = vunpack.c.l.bf16 %v651_v11  ;;  %v294_v17 = vld [vmem:[%s803_s2] sm:$0xff]  ;;  %v297_v21 = vld [vmem:[%s803_s2 + $0x18] sm:$0xff]  ;;  %v295_v22 = vld [vmem:[%s803_s2 + $0x8] sm:$0xff]  ;;  %v445_v44 = vunpack.c.h.bf16 %v651_v11 }
   0x6   :  { %558 = vmatprep.subr.bf16.mxu0 %v557_v6  ;;  %586 = vmatprep.subr.bf16.mxu1 %v557_v6  ;;  %v74_v19 = vld [vmem:[%s801_s1 + $0x40] sm:$0xff]  ;;  %v76_v24 = vld [vmem:[%s801_s1 + $0x50] sm:$0xff]  ;;  %v77_v25 = vld [vmem:[%s801_s1 + $0x58] sm:$0xff] }
   0x7   :  { %529 = vmatprep.mubr.f32.mxu0 %v428_v14  ;;  %541 = vmatprep.mubr.f32.mxu1 %v444_v15  ;;  %v569_v23 = vpack.c.bf16 %v75_v20, %v74_v19  ;;  %v299_v26 = vld [vmem:[%s803_s2 + $0x28] sm:$0xff]  ;;  %v298_v27 = vld [vmem:[%s803_s2 + $0x20] sm:$0xff]  ;;  %v573_v28 = vpack.c.bf16 %v77_v25, %v76_v24  ;;  %v301_v31 = vld [vmem:[%s803_s2 + $0x38] sm:$0xff] }
   0x8   :  { %322 = vperm.xlu1 %603, %v296_v16   ;;  %312 = vperm.xlu0 %602, %v294_v17   ;;  %v78_v29 = vld [vmem:[%s801_s1 + $0x60] sm:$0xff]  ;;  %v79_v30 = vld [vmem:[%s801_s1 + $0x68] sm:$0xff]  ;;  %v300_v32 = vld [vmem:[%s803_s2 + $0x30] sm:$0xff] }
   0x9   :  { %560 = vmatpush3.bf16.msra.mxu0 %v557_v6  ;;  %594 = vmatpush3.bf16.msra.mxu1 %v557_v6  ;;  %v577_v33 = vpack.c.bf16 %v79_v30, %v78_v29  ;;  %v80_v34 = vld [vmem:[%s801_s1 + $0x70] sm:$0xff]  ;;  %v81_v35 = vld [vmem:[%s801_s1 + $0x78] sm:$0xff]  ;;  %v303_v36 = vld [vmem:[%s803_s2 + $0x48] sm:$0xff] }
   0xa   :  { %562 = vmatprep.subr.bf16.mxu0 %v561_v9  ;;  %587 = vmatprep.subr.bf16.mxu1 %v561_v9  ;;  %v302_v37 = vld [vmem:[%s803_s2 + $0x40] sm:$0xff]  ;;  %v581_v38 = vpack.c.bf16 %v81_v35, %v80_v34  ;;  %v305_v39 = vld [vmem:[%s803_s2 + $0x58] sm:$0xff]  ;;  %v304_v40 = vld [vmem:[%s803_s2 + $0x50] sm:$0xff] }
   0xb   :  { %v458_v41 = vld [vmem:[%s802_s0 + $0x8] sm:$0xff]   ;;  %v459_v47 = vld [vmem:[%s802_s0 + $0x10] sm:$0xff]   ;;  %v306_v50 = vld [vmem:[%s803_s2 + $0x60] sm:$0xff] }
   0xc   :  { %327 = vperm.xlu1 %603, %v297_v21   ;;  %317 = vperm.xlu0 %602, %v295_v22   ;;  %v462_v42 = vld [vmem:[%s802_s0 + $0x28] sm:$0xff]   ;;  %v432_v45 = vunpack.c.l.bf16 %v458_v41  ;;  %v463_v48 = vld [vmem:[%s802_s0 + $0x30] sm:$0xff]   ;;  %v433_v51 = vunpack.c.h.bf16 %v458_v41  ;;  %v436_v53 = vunpack.c.l.bf16 %v459_v47  ;;  %v460_v55 = vld [vmem:[%s802_s0 + $0x18] sm:$0xff]   ;;  %v437_v59 = vunpack.c.h.bf16 %v459_v47 }
   0xd   :  { %564 = vmatpush3.bf16.msra.mxu0 %v561_v9  ;;  %595 = vmatpush3.bf16.msra.mxu1 %v561_v9  ;;  %v448_v46 = vunpack.c.l.bf16 %v462_v42  ;;  %v307_v49 = vld [vmem:[%s803_s2 + $0x68] sm:$0xff]  ;;  %v449_v52 = vunpack.c.h.bf16 %v462_v42  ;;  %v452_v54 = vunpack.c.l.bf16 %v463_v48  ;;  %v464_v56 = vld [vmem:[%s802_s0 + $0x38] sm:$0xff]   ;;  %v308_v58 = vld [vmem:[%s803_s2 + $0x70] sm:$0xff]  ;;  %v453_v60 = vunpack.c.h.bf16 %v463_v48 }
   0xe   :  { %566 = vmatprep.subr.bf16.mxu0 %v565_v18  ;;  %588 = vmatprep.subr.bf16.mxu1 %v565_v18  ;;  %v309_v57 = vld [vmem:[%s803_s2 + $0x78] sm:$0xff]  ;;  %v440_v61 = vunpack.c.l.bf16 %v460_v55  ;;  %v456_v62 = vunpack.c.l.bf16 %v464_v56  ;;  %v441_v63 = vunpack.c.h.bf16 %v460_v55  ;;  %v457_v0 = vunpack.c.h.bf16 %v464_v56 }
  0x10   :  { %337 = vperm.xlu1 %603, %v299_v26   ;;  %332 = vperm.xlu0 %602, %v298_v27  }
  0x11   :  { %568 = vmatpush3.bf16.msra.mxu0 %v565_v18  ;;  %596 = vmatpush3.bf16.msra.mxu1 %v565_v18 }
  0x12   :  { %570 = vmatprep.subr.bf16.mxu0 %v569_v23  ;;  %589 = vmatprep.subr.bf16.mxu1 %v569_v23 }
  0x14   :  { %347 = vperm.xlu1 %603, %v301_v31   ;;  %342 = vperm.xlu0 %602, %v300_v32  }
  0x15   :  { %572 = vmatpush3.bf16.msra.mxu0 %v569_v23  ;;  %597 = vmatpush3.bf16.msra.mxu1 %v569_v23 }
  0x16   :  { %574 = vmatprep.subr.bf16.mxu0 %v573_v28  ;;  %590 = vmatprep.subr.bf16.mxu1 %v573_v28 }
  0x18   :  { %357 = vperm.xlu1 %603, %v303_v36   ;;  %352 = vperm.xlu0 %602, %v302_v37  }
  0x19   :  { %576 = vmatpush3.bf16.msra.mxu0 %v573_v28  ;;  %598 = vmatpush3.bf16.msra.mxu1 %v573_v28 }
  0x1a   :  { %578 = vmatprep.subr.bf16.mxu0 %v577_v33  ;;  %591 = vmatprep.subr.bf16.mxu1 %v577_v33 }
  0x1c   :  { %367 = vperm.xlu1 %603, %v305_v39   ;;  %362 = vperm.xlu0 %602, %v304_v40  }
  0x1d   :  { %580 = vmatpush3.bf16.msra.mxu0 %v577_v33  ;;  %599 = vmatpush3.bf16.msra.mxu1 %v577_v33 }
  0x1e   :  { %582 = vmatprep.subr.bf16.mxu0 %v581_v38  ;;  %592 = vmatprep.subr.bf16.mxu1 %v581_v38 }
  0x20   :  { %377 = vperm.xlu1 %603, %v307_v49   ;;  %372 = vperm.xlu0 %602, %v306_v50  }
  0x21   :  { %584 = vmatpush3.bf16.msra.mxu0 %v581_v38  ;;  %600 = vmatpush3.bf16.msra.mxu1 %v581_v38 }
  0x24   :  { %530 = vmatmul.mubr.f32.vlgmr.msra.gmra.mrb[0].mxu0 %v429_v43  ;;  %542 = vmatmul.mubr.f32.vlgmr.msra.gmra.mrb[0].mxu1 %v445_v44 }
  0x25   :  { %532 = vmatprep.mubr.f32.mxu0 %v432_v45  ;;  %544 = vmatprep.mubr.f32.mxu1 %v448_v46 }
  0x26   :  { %387 = vperm.xlu1 %603, %v309_v57   ;;  %382 = vperm.xlu0 %602, %v308_v58  }
  0x28   :  { %533 = vmatmul.mubr.f32.gmra.mrb[2].mxu0 %v433_v51  ;;  %545 = vmatmul.mubr.f32.gmra.mrb[2].mxu1 %v449_v52 }
  0x29   :  { %535 = vmatprep.mubr.f32.mxu0 %v436_v53  ;;  %547 = vmatprep.mubr.f32.mxu1 %v452_v54 }
  0x2c   :  { %536 = vmatmul.mubr.f32.gmra.mrb[4].mxu0 %v437_v59  ;;  %548 = vmatmul.mubr.f32.gmra.mrb[4].mxu1 %v453_v60 }
  0x2d   :  { %538 = vmatprep.mubr.f32.mxu0 %v440_v61  ;;  %550 = vmatprep.mubr.f32.mxu1 %v456_v62 }
  0x30   :  { %539 = vmatmul.mubr.f32.gmra.mrb[6].mxu0 %v441_v63  ;;  %551 = vmatmul.mubr.f32.gmra.mrb[6].mxu1 %v457_v0 }
  0x87   :  { %v323_v1 = vpop.permute.xlu1 %322  ;;  %v313_v2 = vpop.permute.xlu0 %312 }
  0x8b   :  { %v328_v3 = vpop.permute.xlu1 %327  ;;  %v318_v4 = vpop.permute.xlu0 %317 }
  0x8f   :  { %v338_v5 = vpop.permute.xlu1 %337  ;;  %v333_v6 = vpop.permute.xlu0 %332 }
  0x93   :  { %v348_v7 = vpop.permute.xlu1 %347  ;;  %v343_v8 = vpop.permute.xlu0 %342 }
  0x97   :  { %v358_v9 = vpop.permute.xlu1 %357  ;;  %v353_v10 = vpop.permute.xlu0 %352 }
  0x9b   :  { %v368_v11 = vpop.permute.xlu1 %367  ;;  %v363_v12 = vpop.permute.xlu0 %362 }
  0x9f   :  { %v378_v21 = vpop.permute.xlu1 %377  ;;  %v373_v22 = vpop.permute.xlu0 %372 }
  0xa5   :  { %v388_v39 = vpop.permute.xlu1 %387  ;;  %v383_v40 = vpop.permute.xlu0 %382 }
  0xf7   :  { %v531_v13 = vpop.f32.mrb[0].mxu0  ;;  %v543_v14 = vpop.f32.mrb[0].mxu1 }
  0xf8   :  { %v391_v15 = vmul.f32 %v531_v13, %v318_v4  ;;  %v399_v16 = vmul.f32 %v543_v14, %v358_v9  ;;  %v148_v17 = vpop.f32.mrb[1].mxu0  ;;  %v188_v18 = vpop.f32.mrb[1].mxu1 }
  0xf9   :  { %v390_v19 = vmul.f32 %v313_v2, %v148_v17  ;;  %v398_v20 = vmul.f32 %v353_v10, %v188_v18 }
  0xfa   :  { %407 = vst [vmem:[%s804_s3 + $0x8] sm:$0xff] %v391_v15  ;;  %415 = vst [vmem:[%s804_s3 + $0x48] sm:$0xff] %v399_v16 }
  0xfb   :  { %406 = vst [vmem:[%s804_s3] sm:$0xff] %v390_v19  ;;  %414 = vst [vmem:[%s804_s3 + $0x40] sm:$0xff] %v398_v20  ;;  %v534_v23 = vpop.f32.mrb[2].mxu0  ;;  %v546_v24 = vpop.f32.mrb[2].mxu1 }
  0xfc   :  { %v393_v25 = vmul.f32 %v534_v23, %v328_v3  ;;  %v401_v26 = vmul.f32 %v546_v24, %v368_v11  ;;  %v158_v27 = vpop.f32.mrb[3].mxu0  ;;  %v198_v28 = vpop.f32.mrb[3].mxu1 }
  0xfd   :  { %v392_v29 = vmul.f32 %v323_v1, %v158_v27  ;;  %v400_v30 = vmul.f32 %v363_v12, %v198_v28 }
  0xfe   :  { %409 = vst [vmem:[%s804_s3 + $0x18] sm:$0xff] %v393_v25  ;;  %417 = vst [vmem:[%s804_s3 + $0x58] sm:$0xff] %v401_v26 }
  0xff   :  { %408 = vst [vmem:[%s804_s3 + $0x10] sm:$0xff] %v392_v29  ;;  %416 = vst [vmem:[%s804_s3 + $0x50] sm:$0xff] %v400_v30  ;;  %v537_v31 = vpop.f32.mrb[4].mxu0  ;;  %v549_v32 = vpop.f32.mrb[4].mxu1 }
 0x100   :  { %v395_v33 = vmul.f32 %v537_v31, %v338_v5  ;;  %v403_v34 = vmul.f32 %v549_v32, %v378_v21  ;;  %v168_v35 = vpop.f32.mrb[5].mxu0  ;;  %v208_v36 = vpop.f32.mrb[5].mxu1 }
 0x101   :  { %v394_v37 = vmul.f32 %v333_v6, %v168_v35  ;;  %v402_v38 = vmul.f32 %v373_v22, %v208_v36 }
 0x102   :  { %411 = vst [vmem:[%s804_s3 + $0x28] sm:$0xff] %v395_v33  ;;  %419 = vst [vmem:[%s804_s3 + $0x68] sm:$0xff] %v403_v34 }
 0x103   :  { %410 = vst [vmem:[%s804_s3 + $0x20] sm:$0xff] %v394_v37  ;;  %418 = vst [vmem:[%s804_s3 + $0x60] sm:$0xff] %v402_v38  ;;  %v540_v41 = vpop.f32.mrb[6].mxu0  ;;  %v552_v42 = vpop.f32.mrb[6].mxu1 }
 0x104   :  { %v397_v43 = vmul.f32 %v540_v41, %v348_v7  ;;  %v405_v44 = vmul.f32 %v552_v42, %v388_v39  ;;  %v178_v45 = vpop.f32.mrb[7].mxu0  ;;  %v218_v46 = vpop.f32.mrb[7].mxu1 }
 0x105   :  { %v396_v47 = vmul.f32 %v343_v8, %v178_v45  ;;  %v404_v48 = vmul.f32 %v383_v40, %v218_v46 }
 0x106   :  { %413 = vst [vmem:[%s804_s3 + $0x38] sm:$0xff] %v397_v43  ;;  %421 = vst [vmem:[%s804_s3 + $0x78] sm:$0xff] %v405_v44 }
 0x107   :  { %412 = vst [vmem:[%s804_s3 + $0x30] sm:$0xff] %v396_v47  ;;  %420 = vst [vmem:[%s804_s3 + $0x70] sm:$0xff] %v404_v48 }

// kernel: _forward.2
= control target key start
LH: loop header
LB: loop body
LE: loop exit
PB: predicated region body
PF: predicated region fallthrough
CT: control target
= control target key end

     0   :  { %v719_v0 = vmov 0   ;;  %s969_s2 = inlined_call_operand.vmem [shape: f32[128,1], index: 2, kind: input, shape index: {}]   ;;  %s970_s3 = inlined_call_operand.vmem [shape: f32[128,1], index: 3, kind: input, shape index: {}]   ;;  %s971_s0 = inlined_call_operand.vmem [shape: bf16[128,128], index: 0, kind: input, shape index: {}]   ;;  %s972_s1 = inlined_call_operand.vmem [shape: f32[128,128], index: 1, kind: input, shape index: {}]   ;;  %s973_s4 = inlined_call_operand.vmem [shape: f32[128,128], index: 4, kind: output, shape index: {}]  }
   0x1   :  { %718 = vset.pattern.permute.xlu1 %v719_v0  ;;  %717 = vset.pattern.permute.xlu0 %v719_v0  ;;  %v71_v1 = vld [vmem:[%s969_s2 + $0x10] sm:$0xff]  ;;  %v69_v2 = vld [vmem:[%s969_s2] sm:$0xff]  ;;  %v72_v3 = vld [vmem:[%s969_s2 + $0x18] sm:$0xff] }
   0x2   :  { %97 = vperm.xlu1 %718, %v71_v1   ;;  %87 = vperm.xlu0 %717, %v69_v2   ;;  %v70_v4 = vld [vmem:[%s969_s2 + $0x8] sm:$0xff]  ;;  %v73_v6 = vld [vmem:[%s969_s2 + $0x20] sm:$0xff]  ;;  %v76_v7 = vld [vmem:[%s969_s2 + $0x38] sm:$0xff] }
   0x3   :  { %v74_v5 = vld [vmem:[%s969_s2 + $0x28] sm:$0xff]  ;;  %v75_v8 = vld [vmem:[%s969_s2 + $0x30] sm:$0xff]  ;;  %v77_v10 = vld [vmem:[%s969_s2 + $0x40] sm:$0xff] }
   0x4   :  { %v78_v9 = vld [vmem:[%s969_s2 + $0x48] sm:$0xff]  ;;  %v80_v11 = vld [vmem:[%s969_s2 + $0x58] sm:$0xff]  ;;  %v79_v12 = vld [vmem:[%s969_s2 + $0x50] sm:$0xff] }
   0x5   :  { %v82_v13 = vld [vmem:[%s969_s2 + $0x68] sm:$0xff]  ;;  %v81_v14 = vld [vmem:[%s969_s2 + $0x60] sm:$0xff]  ;;  %v84_v15 = vld [vmem:[%s969_s2 + $0x78] sm:$0xff] }
   0x6   :  { %102 = vperm.xlu1 %718, %v72_v3   ;;  %92 = vperm.xlu0 %717, %v70_v4   ;;  %v83_v16 = vld [vmem:[%s969_s2 + $0x70] sm:$0xff]  ;;  %v410_v17 = vld [vmem:[%s970_s3 + $0x8] sm:$0xff]  ;;  %v409_v18 = vld [vmem:[%s970_s3] sm:$0xff] }
   0x7   :  { %v412_v19 = vld [vmem:[%s970_s3 + $0x18] sm:$0xff]  ;;  %v411_v20 = vld [vmem:[%s970_s3 + $0x10] sm:$0xff]  ;;  %v808_v21 = vld [vmem:[%s971_s0] sm:$0xff]  }
   0x8   :  { %v813_v22 = vld [vmem:[%s971_s0 + $0x20] sm:$0xff]   ;;  %v414_v23 = vld [vmem:[%s970_s3 + $0x28] sm:$0xff]  ;;  %v543_v25 = vunpack.c.l.bf16 %v808_v21  ;;  %v416_v27 = vld [vmem:[%s970_s3 + $0x38] sm:$0xff] }
   0x9   :  { %v413_v24 = vld [vmem:[%s970_s3 + $0x20] sm:$0xff]  ;;  %v559_v26 = vunpack.c.l.bf16 %v813_v22  ;;  %v415_v28 = vld [vmem:[%s970_s3 + $0x30] sm:$0xff]  ;;  %v418_v29 = vld [vmem:[%s970_s3 + $0x48] sm:$0xff] }
   0xa   :  { %112 = vperm.xlu1 %718, %v74_v5   ;;  %107 = vperm.xlu0 %717, %v73_v6   ;;  %v417_v30 = vld [vmem:[%s970_s3 + $0x40] sm:$0xff]  ;;  %v420_v31 = vld [vmem:[%s970_s3 + $0x58] sm:$0xff]  ;;  %v419_v32 = vld [vmem:[%s970_s3 + $0x50] sm:$0xff] }
   0xb   :  { %644 = vmatprep.mubr.f32.mxu0 %v543_v25  ;;  %656 = vmatprep.mubr.f32.mxu1 %v559_v26  ;;  %v422_v33 = vld [vmem:[%s970_s3 + $0x68] sm:$0xff]  ;;  %v421_v34 = vld [vmem:[%s970_s3 + $0x60] sm:$0xff]  ;;  %v424_v35 = vld [vmem:[%s970_s3 + $0x78] sm:$0xff] }
   0xc   :  { %v423_v36 = vld [vmem:[%s970_s3 + $0x70] sm:$0xff]  ;;  %v53_v40 = vld [vmem:[%s972_s1] sm:$0xff]  ;;  %v56_v41 = vld [vmem:[%s972_s1 + $0x18] sm:$0xff] }
   0xd   :  { %v55_v39 = vld [vmem:[%s972_s1 + $0x10] sm:$0xff]  ;;  %v54_v42 = vld [vmem:[%s972_s1 + $0x8] sm:$0xff]  ;;  %v57_v50 = vld [vmem:[%s972_s1 + $0x20] sm:$0xff] }
   0xe   :  { %122 = vperm.xlu1 %718, %v76_v7   ;;  %117 = vperm.xlu0 %717, %v75_v8   ;;  %v58_v49 = vld [vmem:[%s972_s1 + $0x28] sm:$0xff]  ;;  %v60_v57 = vld [vmem:[%s972_s1 + $0x38] sm:$0xff]  ;;  %v59_v58 = vld [vmem:[%s972_s1 + $0x30] sm:$0xff] }
   0xf   :  { %v62_v0 = vld [vmem:[%s972_s1 + $0x48] sm:$0xff]  ;;  %v61_v1 = vld [vmem:[%s972_s1 + $0x40] sm:$0xff]  ;;  %v64_v7 = vld [vmem:[%s972_s1 + $0x58] sm:$0xff] }
  0x10   :  { %v63_v8 = vld [vmem:[%s972_s1 + $0x50] sm:$0xff] }
  0x12   :  { %132 = vperm.xlu1 %718, %v78_v9   ;;  %127 = vperm.xlu0 %717, %v77_v10  }
  0x16   :  { %142 = vperm.xlu1 %718, %v80_v11   ;;  %137 = vperm.xlu0 %717, %v79_v12  }
  0x1a   :  { %152 = vperm.xlu1 %718, %v82_v13   ;;  %147 = vperm.xlu0 %717, %v81_v14   ;;  %v66_v14 = vld [vmem:[%s972_s1 + $0x68] sm:$0xff] }
  0x1e   :  { %162 = vperm.xlu1 %718, %v84_v15   ;;  %157 = vperm.xlu0 %717, %v83_v16   ;;  %v65_v15 = vld [vmem:[%s972_s1 + $0x60] sm:$0xff] }
  0x22   :  { %432 = vperm.xlu1 %718, %v410_v17   ;;  %427 = vperm.xlu0 %717, %v409_v18  }
  0x26   :  { %442 = vperm.xlu1 %718, %v412_v19   ;;  %437 = vperm.xlu0 %717, %v411_v20  }
  0x2a   :  { %452 = vperm.xlu1 %718, %v414_v23   ;;  %447 = vperm.xlu0 %717, %v413_v24   ;;  %v68_v23 = vld [vmem:[%s972_s1 + $0x78] sm:$0xff]  ;;  %v67_v24 = vld [vmem:[%s972_s1 + $0x70] sm:$0xff] }
  0x2e   :  { %462 = vperm.xlu1 %718, %v416_v27   ;;  %457 = vperm.xlu0 %717, %v415_v28  }
  0x32   :  { %472 = vperm.xlu1 %718, %v418_v29   ;;  %467 = vperm.xlu0 %717, %v417_v30  }
  0x36   :  { %482 = vperm.xlu1 %718, %v420_v31   ;;  %477 = vperm.xlu0 %717, %v419_v32   ;;  %v573_v31 = vld [vmem:[%s971_s0 + $0x8] sm:$0xff]  }
  0x37   :  { %v577_v32 = vld [vmem:[%s971_s0 + $0x28] sm:$0xff]  }
  0x3a   :  { %492 = vperm.xlu1 %718, %v422_v33   ;;  %487 = vperm.xlu0 %717, %v421_v34   ;;  %v544_v33 = vunpack.c.h.bf16 %v808_v21  ;;  %v560_v34 = vunpack.c.h.bf16 %v813_v22 }
  0x3e   :  { %502 = vperm.xlu1 %718, %v424_v35   ;;  %497 = vperm.xlu0 %717, %v423_v36   ;;  %v547_v35 = vunpack.c.l.bf16 %v573_v31  ;;  %v563_v36 = vunpack.c.l.bf16 %v577_v32 }
  0x81   :  { %v98_v37 = vpop.permute.xlu1 %97  ;;  %v88_v38 = vpop.permute.xlu0 %87 }
  0x82   :  { %v167_v45 = vmul.f32 %v98_v37, %v55_v39  ;;  %v165_v46 = vmul.f32 %v88_v38, %v53_v40  ;;  %v574_v37 = vld [vmem:[%s971_s0 + $0x10] sm:$0xff]   ;;  %v548_v39 = vunpack.c.h.bf16 %v573_v31  ;;  %v564_v40 = vunpack.c.h.bf16 %v577_v32 }
  0x83   :  { %v578_v38 = vld [vmem:[%s971_s0 + $0x30] sm:$0xff]   ;;  %v551_v21 = vunpack.c.l.bf16 %v574_v37 }
  0x84   :  { %v567_v22 = vunpack.c.l.bf16 %v578_v38 }
  0x85   :  { %v103_v43 = vpop.permute.xlu1 %102  ;;  %v93_v44 = vpop.permute.xlu0 %92 }
  0x86   :  { %v168_v47 = vmul.f32 %v103_v43, %v56_v41  ;;  %v166_v48 = vmul.f32 %v93_v44, %v54_v42  ;;  %v575_v41 = vld [vmem:[%s971_s0 + $0x18] sm:$0xff]   ;;  %v552_v43 = vunpack.c.h.bf16 %v574_v37  ;;  %v568_v44 = vunpack.c.h.bf16 %v578_v38 }
  0x87   :  { %v579_v42 = vld [vmem:[%s971_s0 + $0x38] sm:$0xff]  }
  0x88   :  { %v668_v51 = vpack.c.bf16 %v166_v48, %v165_v46  ;;  %v672_v54 = vpack.c.bf16 %v168_v47, %v167_v45  ;;  %v555_v45 = vunpack.c.l.bf16 %v575_v41  ;;  %v571_v46 = vunpack.c.l.bf16 %v579_v42 }
  0x89   :  { %v113_v52 = vpop.permute.xlu1 %112  ;;  %v108_v53 = vpop.permute.xlu0 %107  ;;  %v556_v47 = vunpack.c.h.bf16 %v575_v41  ;;  %v572_v48 = vunpack.c.h.bf16 %v579_v42 }
  0x8a   :  { %v170_v55 = vmul.f32 %v113_v52, %v58_v49  ;;  %v169_v56 = vmul.f32 %v108_v53, %v57_v50  ;;  %669 = vmatprep.subr.bf16.mxu0 %v668_v51  ;;  %700 = vmatprep.subr.bf16.mxu1 %v668_v51 }
  0x8b   :  { %671 = vmatpush3.bf16.msra.mxu0 %v668_v51  ;;  %708 = vmatpush3.bf16.msra.mxu1 %v668_v51 }
  0x8c   :  { %673 = vmatprep.subr.bf16.mxu0 %v672_v54  ;;  %701 = vmatprep.subr.bf16.mxu1 %v672_v54  ;;  %v676_v61 = vpack.c.bf16 %v170_v55, %v169_v56 }
  0x8d   :  { %v123_v59 = vpop.permute.xlu1 %122  ;;  %v118_v60 = vpop.permute.xlu0 %117 }
  0x8e   :  { %v172_v62 = vmul.f32 %v123_v59, %v60_v57  ;;  %v171_v63 = vmul.f32 %v118_v60, %v59_v58 }
  0x8f   :  { %675 = vmatpush3.bf16.msra.mxu0 %v672_v54  ;;  %709 = vmatpush3.bf16.msra.mxu1 %v672_v54 }
  0x90   :  { %677 = vmatprep.subr.bf16.mxu0 %v676_v61  ;;  %702 = vmatprep.subr.bf16.mxu1 %v676_v61  ;;  %v680_v4 = vpack.c.bf16 %v172_v62, %v171_v63 }
  0x91   :  { %v133_v2 = vpop.permute.xlu1 %132  ;;  %v128_v3 = vpop.permute.xlu0 %127 }
  0x92   :  { %v174_v5 = vmul.f32 %v133_v2, %v62_v0  ;;  %v173_v6 = vmul.f32 %v128_v3, %v61_v1 }
  0x93   :  { %679 = vmatpush3.bf16.msra.mxu0 %v676_v61  ;;  %710 = vmatpush3.bf16.msra.mxu1 %v676_v61 }
  0x94   :  { %681 = vmatprep.subr.bf16.mxu0 %v680_v4  ;;  %703 = vmatprep.subr.bf16.mxu1 %v680_v4  ;;  %v684_v11 = vpack.c.bf16 %v174_v5, %v173_v6 }
  0x95   :  { %v143_v9 = vpop.permute.xlu1 %142  ;;  %v138_v10 = vpop.permute.xlu0 %137 }
  0x96   :  { %v176_v12 = vmul.f32 %v143_v9, %v64_v7  ;;  %v175_v13 = vmul.f32 %v138_v10, %v63_v8 }
  0x97   :  { %683 = vmatpush3.bf16.msra.mxu0 %v680_v4  ;;  %711 = vmatpush3.bf16.msra.mxu1 %v680_v4 }
  0x98   :  { %685 = vmatprep.subr.bf16.mxu0 %v684_v11  ;;  %704 = vmatprep.subr.bf16.mxu1 %v684_v11  ;;  %v688_v18 = vpack.c.bf16 %v176_v12, %v175_v13 }
  0x99   :  { %v153_v16 = vpop.permute.xlu1 %152  ;;  %v148_v17 = vpop.permute.xlu0 %147 }
  0x9a   :  { %v178_v19 = vmul.f32 %v153_v16, %v66_v14  ;;  %v177_v20 = vmul.f32 %v148_v17, %v65_v15 }
  0x9b   :  { %687 = vmatpush3.bf16.msra.mxu0 %v684_v11  ;;  %712 = vmatpush3.bf16.msra.mxu1 %v684_v11 }
  0x9c   :  { %689 = vmatprep.subr.bf16.mxu0 %v688_v18  ;;  %705 = vmatprep.subr.bf16.mxu1 %v688_v18  ;;  %v692_v27 = vpack.c.bf16 %v178_v19, %v177_v20 }
  0x9d   :  { %v163_v25 = vpop.permute.xlu1 %162  ;;  %v158_v26 = vpop.permute.xlu0 %157 }
  0x9e   :  { %v180_v28 = vmul.f32 %v163_v25, %v68_v23  ;;  %v179_v29 = vmul.f32 %v158_v26, %v67_v24 }
  0x9f   :  { %691 = vmatpush3.bf16.msra.mxu0 %v688_v18  ;;  %713 = vmatpush3.bf16.msra.mxu1 %v688_v18 }
  0xa0   :  { %693 = vmatprep.subr.bf16.mxu0 %v692_v27  ;;  %706 = vmatprep.subr.bf16.mxu1 %v692_v27  ;;  %v696_v30 = vpack.c.bf16 %v180_v28, %v179_v29 }
  0xa1   :  { %v433_v49 = vpop.permute.xlu1 %432  ;;  %v428_v50 = vpop.permute.xlu0 %427 }
  0xa3   :  { %695 = vmatpush3.bf16.msra.mxu0 %v692_v27  ;;  %714 = vmatpush3.bf16.msra.mxu1 %v692_v27 }
  0xa4   :  { %697 = vmatprep.subr.bf16.mxu0 %v696_v30  ;;  %707 = vmatprep.subr.bf16.mxu1 %v696_v30 }
  0xa5   :  { %v443_v51 = vpop.permute.xlu1 %442  ;;  %v438_v52 = vpop.permute.xlu0 %437 }
  0xa7   :  { %699 = vmatpush3.bf16.msra.mxu0 %v696_v30  ;;  %715 = vmatpush3.bf16.msra.mxu1 %v696_v30 }
  0xa9   :  { %v453_v53 = vpop.permute.xlu1 %452  ;;  %v448_v54 = vpop.permute.xlu0 %447 }
  0xaa   :  { %645 = vmatmul.mubr.f32.vlgmr.msra.gmra.mrb[0].mxu0 %v544_v33  ;;  %657 = vmatmul.mubr.f32.vlgmr.msra.gmra.mrb[0].mxu1 %v560_v34 }
  0xab   :  { %647 = vmatprep.mubr.f32.mxu0 %v547_v35  ;;  %659 = vmatprep.mubr.f32.mxu1 %v563_v36 }
  0xad   :  { %v463_v55 = vpop.permute.xlu1 %462  ;;  %v458_v56 = vpop.permute.xlu0 %457 }
  0xae   :  { %648 = vmatmul.mubr.f32.gmra.mrb[2].mxu0 %v548_v39  ;;  %660 = vmatmul.mubr.f32.gmra.mrb[2].mxu1 %v564_v40 }
  0xaf   :  { %650 = vmatprep.mubr.f32.mxu0 %v551_v21  ;;  %662 = vmatprep.mubr.f32.mxu1 %v567_v22 }
  0xb1   :  { %v473_v57 = vpop.permute.xlu1 %472  ;;  %v468_v58 = vpop.permute.xlu0 %467 }
  0xb2   :  { %651 = vmatmul.mubr.f32.gmra.mrb[4].mxu0 %v552_v43  ;;  %663 = vmatmul.mubr.f32.gmra.mrb[4].mxu1 %v568_v44 }
  0xb3   :  { %653 = vmatprep.mubr.f32.mxu0 %v555_v45  ;;  %665 = vmatprep.mubr.f32.mxu1 %v571_v46 }
  0xb5   :  { %v483_v59 = vpop.permute.xlu1 %482  ;;  %v478_v60 = vpop.permute.xlu0 %477 }
  0xb6   :  { %654 = vmatmul.mubr.f32.gmra.mrb[6].mxu0 %v556_v47  ;;  %666 = vmatmul.mubr.f32.gmra.mrb[6].mxu1 %v572_v48 }
  0xb9   :  { %v493_v5 = vpop.permute.xlu1 %492  ;;  %v488_v6 = vpop.permute.xlu0 %487 }
  0xbd   :  { %v503_v25 = vpop.permute.xlu1 %502  ;;  %v498_v26 = vpop.permute.xlu0 %497 }
 0x17d   :  { %v646_v61 = vpop.f32.mrb[0].mxu0  ;;  %v658_v62 = vpop.f32.mrb[0].mxu1 }
 0x17e   :  { %v506_v63 = vmul.f32 %v646_v61, %v433_v49  ;;  %v514_v0 = vmul.f32 %v658_v62, %v473_v57  ;;  %v263_v1 = vpop.f32.mrb[1].mxu0  ;;  %v303_v2 = vpop.f32.mrb[1].mxu1 }
 0x17f   :  { %v505_v3 = vmul.f32 %v428_v50, %v263_v1  ;;  %v513_v4 = vmul.f32 %v468_v58, %v303_v2 }
 0x180   :  { %522 = vst [vmem:[%s973_s4 + $0x8] sm:$0xff] %v506_v63  ;;  %530 = vst [vmem:[%s973_s4 + $0x48] sm:$0xff] %v514_v0 }
 0x181   :  { %521 = vst [vmem:[%s973_s4] sm:$0xff] %v505_v3  ;;  %529 = vst [vmem:[%s973_s4 + $0x40] sm:$0xff] %v513_v4  ;;  %v649_v7 = vpop.f32.mrb[2].mxu0  ;;  %v661_v8 = vpop.f32.mrb[2].mxu1 }
 0x182   :  { %v508_v9 = vmul.f32 %v649_v7, %v443_v51  ;;  %v516_v10 = vmul.f32 %v661_v8, %v483_v59  ;;  %v273_v11 = vpop.f32.mrb[3].mxu0  ;;  %v313_v12 = vpop.f32.mrb[3].mxu1 }
 0x183   :  { %v507_v13 = vmul.f32 %v438_v52, %v273_v11  ;;  %v515_v14 = vmul.f32 %v478_v60, %v313_v12 }
 0x184   :  { %524 = vst [vmem:[%s973_s4 + $0x18] sm:$0xff] %v508_v9  ;;  %532 = vst [vmem:[%s973_s4 + $0x58] sm:$0xff] %v516_v10 }
 0x185   :  { %523 = vst [vmem:[%s973_s4 + $0x10] sm:$0xff] %v507_v13  ;;  %531 = vst [vmem:[%s973_s4 + $0x50] sm:$0xff] %v515_v14  ;;  %v652_v15 = vpop.f32.mrb[4].mxu0  ;;  %v664_v16 = vpop.f32.mrb[4].mxu1 }
 0x186   :  { %v510_v17 = vmul.f32 %v652_v15, %v453_v53  ;;  %v518_v18 = vmul.f32 %v664_v16, %v493_v5  ;;  %v283_v19 = vpop.f32.mrb[5].mxu0  ;;  %v323_v20 = vpop.f32.mrb[5].mxu1 }
 0x187   :  { %v509_v23 = vmul.f32 %v448_v54, %v283_v19  ;;  %v517_v24 = vmul.f32 %v488_v6, %v323_v20 }
 0x188   :  { %526 = vst [vmem:[%s973_s4 + $0x28] sm:$0xff] %v510_v17  ;;  %534 = vst [vmem:[%s973_s4 + $0x68] sm:$0xff] %v518_v18 }
 0x189   :  { %525 = vst [vmem:[%s973_s4 + $0x20] sm:$0xff] %v509_v23  ;;  %533 = vst [vmem:[%s973_s4 + $0x60] sm:$0xff] %v517_v24  ;;  %v655_v27 = vpop.f32.mrb[6].mxu0  ;;  %v667_v28 = vpop.f32.mrb[6].mxu1 }
 0x18a   :  { %v512_v29 = vmul.f32 %v655_v27, %v463_v55  ;;  %v520_v30 = vmul.f32 %v667_v28, %v503_v25  ;;  %v293_v31 = vpop.f32.mrb[7].mxu0  ;;  %v333_v32 = vpop.f32.mrb[7].mxu1 }
 0x18b   :  { %v511_v33 = vmul.f32 %v458_v56, %v293_v31  ;;  %v519_v34 = vmul.f32 %v498_v26, %v333_v32 }
 0x18c   :  { %528 = vst [vmem:[%s973_s4 + $0x38] sm:$0xff] %v512_v29  ;;  %536 = vst [vmem:[%s973_s4 + $0x78] sm:$0xff] %v520_v30 }
 0x18d   :  { %527 = vst [vmem:[%s973_s4 + $0x30] sm:$0xff] %v511_v33  ;;  %535 = vst [vmem:[%s973_s4 + $0x70] sm:$0xff] %v519_v34 }

</bundles_post_ra>
